<compile_context>
chip_gen: v7x
topology: tpu7x:2x2x1
jax: 0.10.0
libtpu: 0.0.40
codegen_flags: <defaults>
</compile_context>

<pallas_src>
import jax
import jax.numpy as jnp
from jax.experimental import pallas as pl
from jax.experimental.pallas import tpu as pltpu


# ---- packed-weight slab layout (rows; every block starts 8-aligned) ---------
_R_W1 = 0       # conv1 weight (5, 16)
_R_W2 = 8       # conv2 weight (16, 16)
_R_W3 = 24      # conv3 weight (16, 6)
_R_M1E = 40     # mlp2 L1 weight rows for [Xdiag, intens, w_alpha]  (3, 32)
_R_M1S = 48     # mlp2 L1 weight rows for fea_sum                   (6, 32)
_R_M1X = 56     # mlp2 L1 weight rows for fea_max                   (6, 32)
_R_M2 = 64      # mlp2 L2 weight (32, 16)
_R_M3 = 96      # mlp2 L3 weight (16, 1)
_R_B1 = 112     # conv1 bias (16,)
_R_B2 = 120     # conv2 bias (16,)
_R_B3 = 128     # conv3 bias (6,)
_R_BM1 = 136    # mlp2 L1 bias (32,)
_R_BM2 = 144    # mlp2 L2 bias (16,)
_R_BM3 = 152    # mlp2 L3 bias (1,)
_SLAB_ROWS = 160
_SLAB_COLS = 128


def igcnet_kernel(x_ref, ext_ref, wp_ref, out_ref):
    # Block shapes: x_ref (TILE_H*W, 5), ext_ref (TILE_H, 3), out_ref (TILE_H, 1)
    th = ext_ref.shape[0]
    thw = x_ref.shape[0]
    w_pix = thw // th

    # --- unpack weights from the packed slab (static, 8-aligned slices) ------
    w1 = wp_ref[_R_W1:_R_W1 + 5, 0:16]
    w2 = wp_ref[_R_W2:_R_W2 + 16, 0:16]
    w3 = wp_ref[_R_W3:_R_W3 + 16, 0:6]
    wm1e = wp_ref[_R_M1E:_R_M1E + 3, 0:32]
    wm1s = wp_ref[_R_M1S:_R_M1S + 6, 0:32]
    wm1x = wp_ref[_R_M1X:_R_M1X + 6, 0:32]
    wm2 = wp_ref[_R_M2:_R_M2 + 32, 0:16]
    wm3 = wp_ref[_R_M3:_R_M3 + 16, 0:1]
    b1 = wp_ref[_R_B1:_R_B1 + 1, 0:16]
    b2 = wp_ref[_R_B2:_R_B2 + 1, 0:16]
    b3 = wp_ref[_R_B3:_R_B3 + 1, 0:6]
    bm1 = wp_ref[_R_BM1:_R_BM1 + 1, 0:32]
    bm2 = wp_ref[_R_BM2:_R_BM2 + 1, 0:16]
    bm3 = wp_ref[_R_BM3:_R_BM3 + 1, 0:1]

    # --- gcn: three 1x1 convs + ReLU on all TILE_H*W pixels at once ----------
    x = x_ref[...]                                                    # (THW, 5)
    h = jnp.maximum(jnp.dot(x, w1, preferred_element_type=jnp.float32) + b1, 0.0)
    h = jnp.maximum(jnp.dot(h, w2, preferred_element_type=jnp.float32) + b2, 0.0)
    h = jnp.maximum(jnp.dot(h, w3, preferred_element_type=jnp.float32) + b3, 0.0)
    # h: (THW, 6), pixel-major (pixel p = row_in_block * W + w)

    # --- torch.sum over dim=3 (W): block-ones selection matmul on the MXU ----
    pix = jax.lax.broadcasted_iota(jnp.int32, (th, thw), 1)
    row = jax.lax.broadcasted_iota(jnp.int32, (th, thw), 0)
    sel = jnp.logical_and(pix >= row * w_pix,
                          pix < (row + 1) * w_pix).astype(jnp.float32)  # (TH, THW)
    fea_sum = jnp.dot(sel, h, preferred_element_type=jnp.float32)       # (TH, 6)

    # --- torch.max over dim=3 (W): 8-aligned sublane-group reduction ---------
    fea_max = jnp.max(h.reshape(th, w_pix, 6), axis=1)                  # (TH, 6)

    # --- mlp2 batched over the TILE_H rows of this block ---------------------
    # Concat order [Xdiag, intens, fea_sum(6), fea_max(6), w_alpha]; the 15x32
    # first-layer weight was split row-wise so no in-kernel concat is needed.
    ext = ext_ref[...]                                                  # (TH, 3)
    m = (jnp.dot(ext, wm1e, preferred_element_type=jnp.float32)
         + jnp.dot(fea_sum, wm1s, preferred_element_type=jnp.float32)
         + jnp.dot(fea_max, wm1x, preferred_element_type=jnp.float32)
         + bm1)
    m = jnp.maximum(m, 0.0)                                             # (TH, 32)
    m = jnp.maximum(jnp.dot(m, wm2, preferred_element_type=jnp.float32) + bm2, 0.0)
    m = jnp.dot(m, wm3, preferred_element_type=jnp.float32) + bm3       # (TH, 1)
    out_ref[...] = jax.nn.sigmoid(m)


def pack_params(params):
    """Pack all weights/biases into one (8,128)-aligned f32 slab."""
    (w1, b1, w2, b2, w3, b3, wm1, bm1, wm2, bm2, wm3, bm3) = params
    # Split mlp2 first-layer weight (15, 32) by feature source:
    # rows [0:2] -> Xdiag,intens ; [2:8] -> fea_sum ; [8:14] -> fea_max ; [14] -> w_alpha
    wm1_ext = jnp.concatenate([wm1[0:2], wm1[14:15]], axis=0)   # (3, 32)
    wm1_sum = wm1[2:8]                                          # (6, 32)
    wm1_max = wm1[8:14]                                         # (6, 32)

    slab = jnp.zeros((_SLAB_ROWS, _SLAB_COLS), jnp.float32)

    def put(s, r, a):
        a = jnp.asarray(a, jnp.float32)
        if a.ndim == 1:
            a = a.reshape(1, -1)
        return s.at[r:r + a.shape[0], 0:a.shape[1]].set(a)

    slab = put(slab, _R_W1, w1)
    slab = put(slab, _R_W2, w2)
    slab = put(slab, _R_W3, w3)
    slab = put(slab, _R_M1E, wm1_ext)
    slab = put(slab, _R_M1S, wm1_sum)
    slab = put(slab, _R_M1X, wm1_max)
    slab = put(slab, _R_M2, wm2)
    slab = put(slab, _R_M3, wm3)
    slab = put(slab, _R_B1, b1)
    slab = put(slab, _R_B2, b2)
    slab = put(slab, _R_B3, b3)
    slab = put(slab, _R_BM1, bm1)
    slab = put(slab, _R_BM2, bm2)
    slab = put(slab, _R_BM3, bm3)
    return slab


def igcnet_forward(x, Xdiag, intens, w_alpha, params, *, tile_h=None):
    N, Cin, H, W = x.shape
    assert Cin == 5
    if tile_h is None:
        tile_h = H                       # whole image per grid step
    assert H % tile_h == 0
    thw = tile_h * W

    slab = pack_params(params)

    # NCHW -> pixel-major (N, H*W, 5); channels land on the lane axis.
    x_pix = jnp.transpose(x, (0, 2, 3, 1)).reshape(N, H * W, Cin).astype(jnp.float32)
    # Per-row extras in concat order [Xdiag, intens, w_alpha] -> (N, H, 3)
    ext = jnp.transpose(jnp.concatenate([Xdiag, intens, w_alpha], axis=1), (0, 2, 1))
    ext = ext.astype(jnp.float32)

    out = pl.pallas_call(
        igcnet_kernel,
        out_shape=jax.ShapeDtypeStruct((N, H, 1), jnp.float32),
        grid=(N, H // tile_h),
        in_specs=[
            pl.BlockSpec((None, thw, Cin), lambda n, hb: (n, hb, 0)),        # x block
            pl.BlockSpec((None, tile_h, 3), lambda n, hb: (n, hb, 0)),       # ext block
            pl.BlockSpec((_SLAB_ROWS, _SLAB_COLS), lambda n, hb: (0, 0)),    # weights
        ],
        out_specs=pl.BlockSpec((None, tile_h, 1), lambda n, hb: (n, hb, 0)),
        compiler_params=pltpu.CompilerParams(
            dimension_semantics=("parallel", "parallel")),
    )(x_pix, ext, slab)

    return out                                                   # (N, H, 1)


def init_params(key):
    ks = jax.random.split(key, 12)

    def w(k, shape, scale):
        return jax.random.normal(k, shape, jnp.float32) * scale

    # Conv weights stored as (in_c, out_c); Linear weights as (in, out).
    w1, b1 = w(ks[0], (5, 16), 0.3), w(ks[1], (16,), 0.1)
    w2, b2 = w(ks[2], (16, 16), 0.2), w(ks[3], (16,), 0.1)
    w3, b3 = w(ks[4], (16, 6), 0.2), w(ks[5], (6,), 0.1)
    wm1, bm1 = w(ks[6], (15, 32), 0.2), w(ks[7], (32,), 0.1)
    wm2, bm2 = w(ks[8], (32, 16), 0.2), w(ks[9], (16,), 0.1)
    wm3, bm3 = w(ks[10], (16, 1), 0.2), w(ks[11], (1,), 0.1)
    return (w1, b1, w2, b2, w3, b3, wm1, bm1, wm2, bm2, wm3, bm3)


def reference_forward(x, Xdiag, intens, w_alpha, params):
    # Pure-JAX replica of the PyTorch forward (for correctness check).
    (w1, b1, w2, b2, w3, b3, wm1, bm1, wm2, bm2, wm3, bm3) = params
    xh = jnp.transpose(x, (0, 2, 3, 1))                    # (N, H, W, 5)
    h = jax.nn.relu(xh @ w1 + b1)
    h = jax.nn.relu(h @ w2 + b2)
    h = jax.nn.relu(h @ w3 + b3)                           # (N, H, W, 6)
    fea_sum = jnp.sum(h, axis=2)                           # torch.sum(dim=3)
    fea_max = jnp.max(h, axis=2)                           # torch.max(dim=3)
    xd = jnp.transpose(Xdiag, (0, 2, 1))
    it = jnp.transpose(intens, (0, 2, 1))
    wa = jnp.transpose(w_alpha, (0, 2, 1))
    mlp_in = jnp.concatenate([xd, it, fea_sum, fea_max, wa], axis=-1)  # (N, H, 15)
    m = jax.nn.relu(mlp_in @ wm1 + bm1)
    m = jax.nn.relu(m @ wm2 + bm2)
    m = m @ wm3 + bm3
    return jax.nn.sigmoid(m)


if __name__ == "__main__":
    N, K = 2, 16  # batch, number of links (H = W = K)
    key = jax.random.PRNGKey(0)
    kx, kd, ki, kw, kp = jax.random.split(key, 5)
    x = jax.random.normal(kx, (N, 5, K, K), jnp.float32)
    Xdiag = jax.random.normal(kd, (N, 1, K), jnp.float32)
    intens = jax.random.normal(ki, (N, 1, K), jnp.float32)
    w_alpha = jax.random.normal(kw, (N, 1, K), jnp.float32)
    params = init_params(kp)

    fwd = jax.jit(lambda xx, xd, it, wa: igcnet_forward(xx, xd, it, wa, params))
    pred = jax.block_until_ready(fwd(x, Xdiag, intens, w_alpha))

    ref = reference_forward(x, Xdiag, intens, w_alpha, params)
    assert pred.shape == (N, K, 1)
    assert jnp.allclose(pred, ref, atol=2e-5, rtol=2e-5), \
        float(jnp.max(jnp.abs(pred - ref)))
    print("KERNEL_OK")
</pallas_src>

<mosaic_0001>
module attributes {stable_mosaic.version = 11 : i64} {
  func.func @igcnet_kernel(%arg0: i32, %arg1: i32, %arg2: memref<1x256x5xf32, #tpu.memory_space<vmem>>, %arg3: memref<1x16x3xf32, #tpu.memory_space<vmem>>, %arg4: memref<160x128xf32, #tpu.memory_space<vmem>>, %arg5: memref<1x16x1xf32, #tpu.memory_space<vmem>>) attributes {dimension_semantics = [#tpu.dimension_semantics<parallel>, #tpu.dimension_semantics<parallel>], iteration_bounds = array<i64: 2, 1>, scalar_prefetch = 0 : i64, scratch_operands = 0 : i64, tpu.core_type = #tpu.core_type<tc>, window_params = [{transform_indices = @transform_0, window_bounds = array<i64: 1, 256, 5>}, {transform_indices = @transform_1, window_bounds = array<i64: 1, 16, 3>}, {pipeline_mode = #tpu.pipeline_mode<synchronous>, transform_indices = @transform_2, window_bounds = array<i64: 160, 128>}, {transform_indices = @transform_3, window_bounds = array<i64: 1, 16, 1>}]} {
    %c0 = arith.constant 0 : index
    %c0_0 = arith.constant 0 : index
    %0 = vector.load %arg4[%c0, %c0_0] : memref<160x128xf32, #tpu.memory_space<vmem>>, vector<5x16xf32>
    %c8 = arith.constant 8 : index
    %c0_1 = arith.constant 0 : index
    %1 = vector.load %arg4[%c8, %c0_1] : memref<160x128xf32, #tpu.memory_space<vmem>>, vector<16x16xf32>
    %c24 = arith.constant 24 : index
    %c0_2 = arith.constant 0 : index
    %2 = vector.load %arg4[%c24, %c0_2] : memref<160x128xf32, #tpu.memory_space<vmem>>, vector<16x6xf32>
    %c40 = arith.constant 40 : index
    %c0_3 = arith.constant 0 : index
    %3 = vector.load %arg4[%c40, %c0_3] : memref<160x128xf32, #tpu.memory_space<vmem>>, vector<3x32xf32>
    %c48 = arith.constant 48 : index
    %c0_4 = arith.constant 0 : index
    %4 = vector.load %arg4[%c48, %c0_4] : memref<160x128xf32, #tpu.memory_space<vmem>>, vector<6x32xf32>
    %c56 = arith.constant 56 : index
    %c0_5 = arith.constant 0 : index
    %5 = vector.load %arg4[%c56, %c0_5] : memref<160x128xf32, #tpu.memory_space<vmem>>, vector<6x32xf32>
    %c64 = arith.constant 64 : index
    %c0_6 = arith.constant 0 : index
    %6 = vector.load %arg4[%c64, %c0_6] : memref<160x128xf32, #tpu.memory_space<vmem>>, vector<32x16xf32>
    %c96 = arith.constant 96 : index
    %c0_7 = arith.constant 0 : index
    %7 = vector.load %arg4[%c96, %c0_7] : memref<160x128xf32, #tpu.memory_space<vmem>>, vector<16x1xf32>
    %c112 = arith.constant 112 : index
    %c0_8 = arith.constant 0 : index
    %8 = vector.load %arg4[%c112, %c0_8] : memref<160x128xf32, #tpu.memory_space<vmem>>, vector<1x16xf32>
    %c120 = arith.constant 120 : index
    %c0_9 = arith.constant 0 : index
    %9 = vector.load %arg4[%c120, %c0_9] : memref<160x128xf32, #tpu.memory_space<vmem>>, vector<1x16xf32>
    %c128 = arith.constant 128 : index
    %c0_10 = arith.constant 0 : index
    %10 = vector.load %arg4[%c128, %c0_10] : memref<160x128xf32, #tpu.memory_space<vmem>>, vector<1x6xf32>
    %c136 = arith.constant 136 : index
    %c0_11 = arith.constant 0 : index
    %11 = vector.load %arg4[%c136, %c0_11] : memref<160x128xf32, #tpu.memory_space<vmem>>, vector<1x32xf32>
    %c144 = arith.constant 144 : index
    %c0_12 = arith.constant 0 : index
    %12 = vector.load %arg4[%c144, %c0_12] : memref<160x128xf32, #tpu.memory_space<vmem>>, vector<1x16xf32>
    %c152 = arith.constant 152 : index
    %c0_13 = arith.constant 0 : index
    %13 = vector.load %arg4[%c152, %c0_13] : memref<160x128xf32, #tpu.memory_space<vmem>>, vector<1x1xf32>
    %c0_14 = arith.constant 0 : index
    %c0_15 = arith.constant 0 : index
    %c0_16 = arith.constant 0 : index
    %14 = vector.load %arg2[%c0_14, %c0_15, %c0_16] : memref<1x256x5xf32, #tpu.memory_space<vmem>>, vector<1x256x5xf32>
    %15 = vector.shape_cast %14 : vector<1x256x5xf32> to vector<256x5xf32>
    %cst = arith.constant dense<0.000000e+00> : vector<256x16xf32>
    %16 = tpu.matmul %15, %0, %cst {dimension_numbers = #tpu.dot_dimension_numbers<[1], [0], [0], [1], [0, 0, 1, 1], [], []>} : vector<256x5xf32>, vector<5x16xf32>, vector<256x16xf32> -> vector<256x16xf32>
    %17 = vector.broadcast %8 : vector<1x16xf32> to vector<256x16xf32>
    %18 = arith.addf %16, %17 : vector<256x16xf32>
    %cst_17 = arith.constant 0.000000e+00 : f32
    %19 = vector.broadcast %cst_17 : f32 to vector<256x16xf32>
    %20 = arith.maximumf %18, %19 : vector<256x16xf32>
    %cst_18 = arith.constant dense<0.000000e+00> : vector<256x16xf32>
    %21 = tpu.matmul %20, %1, %cst_18 {dimension_numbers = #tpu.dot_dimension_numbers<[1], [0], [0], [1], [0, 0, 1, 1], [], []>} : vector<256x16xf32>, vector<16x16xf32>, vector<256x16xf32> -> vector<256x16xf32>
    %22 = vector.broadcast %9 : vector<1x16xf32> to vector<256x16xf32>
    %23 = arith.addf %21, %22 : vector<256x16xf32>
    %cst_19 = arith.constant 0.000000e+00 : f32
    %24 = vector.broadcast %cst_19 : f32 to vector<256x16xf32>
    %25 = arith.maximumf %23, %24 : vector<256x16xf32>
    %cst_20 = arith.constant dense<0.000000e+00> : vector<256x6xf32>
    %26 = tpu.matmul %25, %2, %cst_20 {dimension_numbers = #tpu.dot_dimension_numbers<[1], [0], [0], [1], [0, 0, 1, 1], [], []>} : vector<256x16xf32>, vector<16x6xf32>, vector<256x6xf32> -> vector<256x6xf32>
    %27 = vector.broadcast %10 : vector<1x6xf32> to vector<256x6xf32>
    %28 = arith.addf %26, %27 : vector<256x6xf32>
    %cst_21 = arith.constant 0.000000e+00 : f32
    %29 = vector.broadcast %cst_21 : f32 to vector<256x6xf32>
    %30 = arith.maximumf %28, %29 : vector<256x6xf32>
    %31 = tpu.iota {dimensions = array<i32: 1>} : vector<16x256xi32>
    %32 = tpu.iota {dimensions = array<i32: 0>} : vector<16x256xi32>
    %c16_i32 = arith.constant 16 : i32
    %33 = vector.broadcast %c16_i32 : i32 to vector<16x256xi32>
    %34 = arith.muli %32, %33 : vector<16x256xi32>
    %35 = arith.cmpi sge, %31, %34 : vector<16x256xi32>
    %c1_i32 = arith.constant 1 : i32
    %36 = vector.broadcast %c1_i32 : i32 to vector<16x256xi32>
    %37 = arith.addi %32, %36 : vector<16x256xi32>
    %c16_i32_22 = arith.constant 16 : i32
    %38 = vector.broadcast %c16_i32_22 : i32 to vector<16x256xi32>
    %39 = arith.muli %37, %38 : vector<16x256xi32>
    %40 = arith.cmpi slt, %31, %39 : vector<16x256xi32>
    %41 = arith.andi %35, %40 : vector<16x256xi1>
    %42 = arith.extui %41 : vector<16x256xi1> to vector<16x256xi32>
    %43 = arith.sitofp %42 : vector<16x256xi32> to vector<16x256xf32>
    %cst_23 = arith.constant dense<0.000000e+00> : vector<16x6xf32>
    %44 = tpu.matmul %43, %30, %cst_23 {dimension_numbers = #tpu.dot_dimension_numbers<[1], [0], [0], [1], [0, 0, 1, 1], [], []>} : vector<16x256xf32>, vector<256x6xf32>, vector<16x6xf32> -> vector<16x6xf32>
    %45 = vector.shape_cast %30 : vector<256x6xf32> to vector<16x16x6xf32>
    %cst_24 = arith.constant dense<0xFF800000> : vector<16x6xf32>
    %46 = vector.multi_reduction <maximumf>, %45, %cst_24 [1] : vector<16x16x6xf32> to vector<16x6xf32>
    %c0_25 = arith.constant 0 : index
    %c0_26 = arith.constant 0 : index
    %c0_27 = arith.constant 0 : index
    %47 = vector.load %arg3[%c0_25, %c0_26, %c0_27] : memref<1x16x3xf32, #tpu.memory_space<vmem>>, vector<1x16x3xf32>
    %48 = vector.shape_cast %47 : vector<1x16x3xf32> to vector<16x3xf32>
    %cst_28 = arith.constant dense<0.000000e+00> : vector<16x32xf32>
    %49 = tpu.matmul %48, %3, %cst_28 {dimension_numbers = #tpu.dot_dimension_numbers<[1], [0], [0], [1], [0, 0, 1, 1], [], []>} : vector<16x3xf32>, vector<3x32xf32>, vector<16x32xf32> -> vector<16x32xf32>
    %cst_29 = arith.constant dense<0.000000e+00> : vector<16x32xf32>
    %50 = tpu.matmul %44, %4, %cst_29 {dimension_numbers = #tpu.dot_dimension_numbers<[1], [0], [0], [1], [0, 0, 1, 1], [], []>} : vector<16x6xf32>, vector<6x32xf32>, vector<16x32xf32> -> vector<16x32xf32>
    %51 = arith.addf %49, %50 : vector<16x32xf32>
    %cst_30 = arith.constant dense<0.000000e+00> : vector<16x32xf32>
    %52 = tpu.matmul %46, %5, %cst_30 {dimension_numbers = #tpu.dot_dimension_numbers<[1], [0], [0], [1], [0, 0, 1, 1], [], []>} : vector<16x6xf32>, vector<6x32xf32>, vector<16x32xf32> -> vector<16x32xf32>
    %53 = arith.addf %51, %52 : vector<16x32xf32>
    %54 = vector.broadcast %11 : vector<1x32xf32> to vector<16x32xf32>
    %55 = arith.addf %53, %54 : vector<16x32xf32>
    %cst_31 = arith.constant 0.000000e+00 : f32
    %56 = vector.broadcast %cst_31 : f32 to vector<16x32xf32>
    %57 = arith.maximumf %55, %56 : vector<16x32xf32>
    %cst_32 = arith.constant dense<0.000000e+00> : vector<16x16xf32>
    %58 = tpu.matmul %57, %6, %cst_32 {dimension_numbers = #tpu.dot_dimension_numbers<[1], [0], [0], [1], [0, 0, 1, 1], [], []>} : vector<16x32xf32>, vector<32x16xf32>, vector<16x16xf32> -> vector<16x16xf32>
    %59 = vector.broadcast %12 : vector<1x16xf32> to vector<16x16xf32>
    %60 = arith.addf %58, %59 : vector<16x16xf32>
    %cst_33 = arith.constant 0.000000e+00 : f32
    %61 = vector.broadcast %cst_33 : f32 to vector<16x16xf32>
    %62 = arith.maximumf %60, %61 : vector<16x16xf32>
    %cst_34 = arith.constant dense<0.000000e+00> : vector<16x1xf32>
    %63 = tpu.matmul %62, %7, %cst_34 {dimension_numbers = #tpu.dot_dimension_numbers<[1], [0], [0], [1], [0, 0, 1, 1], [], []>} : vector<16x16xf32>, vector<16x1xf32>, vector<16x1xf32> -> vector<16x1xf32>
    %64 = vector.broadcast %13 : vector<1x1xf32> to vector<16x1xf32>
    %65 = arith.addf %63, %64 : vector<16x1xf32>
    %66 = arith.negf %65 : vector<16x1xf32>
    %67 = math.exp %66 : vector<16x1xf32>
    %cst_35 = arith.constant 1.000000e+00 : f32
    %68 = vector.broadcast %cst_35 : f32 to vector<16x1xf32>
    %69 = arith.addf %68, %67 : vector<16x1xf32>
    %70 = arith.divf %68, %69 : vector<16x1xf32>
    %c0_36 = arith.constant 0 : index
    %c0_37 = arith.constant 0 : index
    %c0_38 = arith.constant 0 : index
    %71 = vector.load %arg5[%c0_36, %c0_37, %c0_38] : memref<1x16x1xf32, #tpu.memory_space<vmem>>, vector<1x16x1xf32>
    %72 = vector.shape_cast %71 : vector<1x16x1xf32> to vector<16x1xf32>
    %73 = vector.shape_cast %70 : vector<16x1xf32> to vector<1x16x1xf32>
    tpu.vector_store %arg5[%c0_36, %c0_37, %c0_38], %73 {strides = array<i32>} : memref<1x16x1xf32, #tpu.memory_space<vmem>>, vector<1x16x1xf32>,
    return
  }
  func.func @transform_0(%arg0: i32, %arg1: i32) -> (i32, i32, i32) {
    %c0_i32 = arith.constant 0 : i32
    %c0_i32_0 = arith.constant 0 : i32
    return %arg0, %arg1, %c0_i32 : i32, i32, i32
  }
  func.func @transform_1(%arg0: i32, %arg1: i32) -> (i32, i32, i32) {
    %c0_i32 = arith.constant 0 : i32
    %c0_i32_0 = arith.constant 0 : i32
    return %arg0, %arg1, %c0_i32 : i32, i32, i32
  }
  func.func @transform_2(%arg0: i32, %arg1: i32) -> (i32, i32) {
    %c0_i32 = arith.constant 0 : i32
    %c0_i32_0 = arith.constant 0 : i32
    %c0_i32_1 = arith.constant 0 : i32
    return %c0_i32, %c0_i32_0 : i32, i32
  }
  func.func @transform_3(%arg0: i32, %arg1: i32) -> (i32, i32, i32) {
    %c0_i32 = arith.constant 0 : i32
    %c0_i32_0 = arith.constant 0 : i32
    return %arg0, %arg1, %c0_i32 : i32, i32, i32
  }
}

</mosaic_0001>

<bundles_post_ra>
// kernel: _lambda_.1
= control target key start
LH: loop header
LB: loop body
LE: loop exit
PB: predicated region body
PF: predicated region fallthrough
CT: control target
= control target key end

     0   :  { %s2845_s12 = smov 0   ;;  %s2847_s13 = smov 0   ;;  %s3343_s0 = inlined_call_operand.vmem [shape: f32[2,256,5], index: 0, kind: input, shape index: {}]   ;;  %s3344_s1 = inlined_call_operand.vmem [shape: f32[2,16,3], index: 1, kind: input, shape index: {}]   ;;  %s3345_s2 = inlined_call_operand.vmem [shape: f32[160,128], index: 2, kind: input, shape index: {}]   ;;  %s3346_s3 = inlined_call_operand.vmem [shape: f32[2,16,1], index: 3, kind: output, shape index: {}]  }
   0x1   :  { %s2849_s14 = smov 0  }
   0x2 LB: > { %s25_s15 = sadd.s32 1, %s2818_s13  ;;  %p2226_p0 = scmp.ge.s32.totalorder %s2822_s14, 1  ;;  %s2822_s14 = sphi %s2849_s14, %s13_s14   ;;  %s2818_s13 = sphi %s2847_s13, %s3364_s13   ;;  %s2814_s12 = sphi %s2845_s12, %s3363_s12  }
   0x3   : > { %p27_p1 = scmp.ge.s32.totalorder %s25_s15, 2  ;;  %p175_p2 = scmp.lt.s32.totalorder %s2822_s14, 3 }
   0x5   : > { %s3366_s15 = smov (%p27_p1, %s25_s15), 0  ;;  %p176_p3 = pnand %p2226_p0, %p175_p2 }
   0x6   : > { %v246_v0 = vld [vmem:[%s3345_s2] sm:$0x1f] (!%p176_p3)  ;;  %vm399_vm0 = vcmask (!%p176_p3), 1044480   ;;  %p217_p4 = scmp.lt.s32.totalorder (!%p176_p3), %s2814_s12, 1  ;;  %vm302_vm1 = vcmask (!%p176_p3), 39936   ;;  %v247_v33 = vld [vmem:[%s3345_s2 + $0x8] sm:$0xff] (!%p176_p3) }
   0x7   : > { %179 = sbr.rel (%p176_p3) target bundleno = 1653 (0x675), region = 32  ;;  %2522 = vmatprep.subr.msk.mxu0 (!%p176_p3), %vm399_vm0, %v246_v0  ;;  %2761 = vmatprep.subr.msk.mxu1 (!%p176_p3), %vm399_vm0, %v246_v0  ;;  %v248_v34 = vld [vmem:[%s3345_s2 + $0x10] sm:$0xff] (!%p176_p3)  ;;  %v249_v36 = vld [vmem:[%s3345_s2 + $0x18] sm:$0xff] (!%p176_p3)  ;;  %v250_v37 = vld [vmem:[%s3345_s2 + $0x20] sm:$0xff] (!%p176_p3)  ;;  %vm3347_vm2 = vcmask (!%p176_p3), 130048   ;;  %vm1482_vm15 = vcmask (!%p176_p3), 48128  }
   0x8   : > { %2523 = vmatpush3.msk.msra.mxu0 (!%p176_p3), %vm399_vm0, %v246_v0  ;;  %2762 = vmatpush3.msk.msra.mxu1 (!%p176_p3), %vm399_vm0, %v246_v0  ;;  %v2709_v35 = vpack.c.bf16 (!%p176_p3), %v248_v34, %v247_v33  ;;  %v2713_v38 = vpack.c.bf16 (!%p176_p3), %v250_v37, %v249_v36  ;;  %v2953_v39 = vld [vmem:[%s3345_s2 + $0x70] ss:$0 sm:$0xff] (!%p176_p3)  ;;  %vm1816_vm0 = vcmask (!%p176_p3), 1041409   ;;  %vm1828_vm14 = vcmask (!%p176_p3), 1047559  }
   0xa   : > { %2710 = vmatprep.subr.bf16.mxu1 (!%p176_p3), %v2709_v35  ;;  %2714 = vmatprep.subr.bf16.mxu0 (!%p176_p3), %v2713_v38 }
   0xe   : > { %s3368_s12 = smov (!%p217_p4, %s2814_s12), 1 }
   0xf   : > { %s2361_s18 = sshll.u32 %s3368_s12, 8  ;;  %s2362_s17 = sshll.u32 %s3368_s12, 4 }
  0x10   : > { %s2872_s21 = scalar_lea.vmem %s3343_s0, %s2361_s18  ;;  %s234_s20 = scalar_lea.vmem %s3344_s1, %s2362_s17 }
  0x11   : > { %v266_v1 = vld [vmem:[%s2872_s21] sm:$0xff]  ;;  %v267_v2 = vld [vmem:[%s2872_s21 + $0x8] sm:$0xff]  ;;  %v268_v3 = vld [vmem:[%s2872_s21 + $0x10] sm:$0xff] }
  0x12   : > { %2524 = vmatprep.mubr.msk.f32.mxu0 %vm302_vm1, %v266_v1  ;;  %v269_v4 = vld [vmem:[%s2872_s21 + $0x18] sm:$0xff]  ;;  %v270_v5 = vld [vmem:[%s2872_s21 + $0x20] sm:$0xff]  ;;  %v271_v6 = vld [vmem:[%s2872_s21 + $0x28] sm:$0xff] }
  0x13   : > { %2525 = vmatmul.mubr.msk.f32.vlgmr.msra.gmra.mrb[0].mxu0 %vm302_vm1, %v267_v2  ;;  %v272_v7 = vld [vmem:[%s2872_s21 + $0x30] sm:$0xff]  ;;  %v290_v8 = vld [vmem:[%s2872_s21 + $0xc0] sm:$0xff]  ;;  %v291_v9 = vld [vmem:[%s2872_s21 + $0xc8] sm:$0xff] }
  0x14   : > { %2527 = vmatprep.mubr.msk.f32.mxu0 %vm302_vm1, %v268_v3  ;;  %v292_v10 = vld [vmem:[%s2872_s21 + $0xd0] sm:$0xff]  ;;  %2560 = vmatprep.mubr.msk.f32.mxu1 %vm302_vm1, %v290_v8  ;;  %v273_v11 = vld [vmem:[%s2872_s21 + $0x38] sm:$0xff]  ;;  %v274_v13 = vld [vmem:[%s2872_s21 + $0x40] sm:$0xff] }
  0x15   : > { %2561 = vmatmul.mubr.msk.f32.vlgmr.msra.gmra.mrb[0].mxu1 %vm302_vm1, %v291_v9  ;;  %v293_v12 = vld [vmem:[%s2872_s21 + $0xd8] sm:$0xff]  ;;  %v294_v14 = vld [vmem:[%s2872_s21 + $0xe0] sm:$0xff]  ;;  %v275_v15 = vld [vmem:[%s2872_s21 + $0x48] sm:$0xff]  ;;  %2716 = vmatpush3.bf16.msra.mxu0 %v2713_v38 }
  0x16   : > { %2563 = vmatprep.mubr.msk.f32.mxu1 %vm302_vm1, %v292_v10  ;;  %v295_v16 = vld [vmem:[%s2872_s21 + $0xe8] sm:$0xff]  ;;  %v276_v17 = vld [vmem:[%s2872_s21 + $0x50] sm:$0xff]  ;;  %v277_v19 = vld [vmem:[%s2872_s21 + $0x58] sm:$0xff]  ;;  %2712 = vmatpush3.bf16.msra.mxu1 %v2709_v35 }
  0x17   : > { %2528 = vmatmul.mubr.msk.f32.gmra.mrb[2].mxu0 %vm302_vm1, %v269_v4  ;;  %v296_v18 = vld [vmem:[%s2872_s21 + $0xf0] sm:$0xff]  ;;  %v297_v20 = vld [vmem:[%s2872_s21 + $0xf8] sm:$0xff]  ;;  %v278_v21 = vld [vmem:[%s2872_s21 + $0x60] sm:$0xff] }
  0x18   : > { %2530 = vmatprep.mubr.msk.f32.mxu0 %vm302_vm1, %v270_v5  ;;  %v279_v22 = vld [vmem:[%s2872_s21 + $0x68] sm:$0xff]  ;;  %v280_v23 = vld [vmem:[%s2872_s21 + $0x70] sm:$0xff]  ;;  %v281_v24 = vld [vmem:[%s2872_s21 + $0x78] sm:$0xff] }
  0x19   : > { %2564 = vmatmul.mubr.msk.f32.gmra.mrb[2].mxu1 %vm302_vm1, %v293_v12  ;;  %v282_v25 = vld [vmem:[%s2872_s21 + $0x80] sm:$0xff]  ;;  %v283_v26 = vld [vmem:[%s2872_s21 + $0x88] sm:$0xff]  ;;  %v284_v27 = vld [vmem:[%s2872_s21 + $0x90] sm:$0xff] }
  0x1a   : > { %2566 = vmatprep.mubr.msk.f32.mxu1 %vm302_vm1, %v294_v14  ;;  %v285_v28 = vld [vmem:[%s2872_s21 + $0x98] sm:$0xff]  ;;  %v286_v29 = vld [vmem:[%s2872_s21 + $0xa0] sm:$0xff]  ;;  %v287_v30 = vld [vmem:[%s2872_s21 + $0xa8] sm:$0xff] }
  0x1b   : > { %2531 = vmatmul.mubr.msk.f32.gmra.mrb[4].mxu0 %vm302_vm1, %v271_v6  ;;  %v288_v31 = vld [vmem:[%s2872_s21 + $0xb0] sm:$0xff]  ;;  %v289_v32 = vld [vmem:[%s2872_s21 + $0xb8] sm:$0xff]  ;;  %s244_s21 = scalar_lea.vmem %s3346_s3, %s2362_s17 }
  0x1c   : > { %2533 = vmatprep.mubr.msk.f32.mxu0 %vm302_vm1, %v272_v7 }
  0x1d   : > { %2567 = vmatmul.mubr.msk.f32.gmra.mrb[4].mxu1 %vm302_vm1, %v295_v16 }
  0x1e   : > { %2569 = vmatprep.mubr.msk.f32.mxu1 %vm302_vm1, %v296_v18 }
  0x1f   : > { %2534 = vmatmul.mubr.msk.f32.gmra.mrb[6].mxu0 %vm302_vm1, %v273_v11 }
  0x20   : > { %2536 = vmatprep.mubr.msk.f32.mxu0 %vm302_vm1, %v274_v13 }
  0x21   : > { %2570 = vmatmul.mubr.msk.f32.gmra.mrb[6].mxu1 %vm302_vm1, %v297_v20 }
  0x23   : > { %2537 = vmatmul.mubr.msk.f32.gmra.mrb[8].mxu0 %vm302_vm1, %v275_v15 }
  0x24   : > { %2539 = vmatprep.mubr.msk.f32.mxu0 %vm302_vm1, %v276_v17 }
  0x27   : > { %2540 = vmatmul.mubr.msk.f32.gmra.mrb[10].mxu0 %vm302_vm1, %v277_v19 }
  0x28   : > { %2542 = vmatprep.mubr.msk.f32.mxu0 %vm302_vm1, %v278_v21 }
  0x2b   : > { %2543 = vmatmul.mubr.msk.f32.gmra.mrb[12].mxu0 %vm302_vm1, %v279_v22 }
  0x2c   : > { %2545 = vmatprep.mubr.msk.f32.mxu0 %vm302_vm1, %v280_v23 }
  0x2f   : > { %2546 = vmatmul.mubr.msk.f32.gmra.mrb[14].mxu0 %vm302_vm1, %v281_v24 }
  0x30   : > { %2548 = vmatprep.mubr.msk.f32.mxu0 %vm302_vm1, %v282_v25 }
  0x33   : > { %2549 = vmatmul.mubr.msk.f32.gmra.mrb[16].mxu0 %vm302_vm1, %v283_v26 }
  0x34   : > { %2551 = vmatprep.mubr.msk.f32.mxu0 %vm302_vm1, %v284_v27 }
  0x37   : > { %2552 = vmatmul.mubr.msk.f32.gmra.mrb[18].mxu0 %vm302_vm1, %v285_v28 }
  0x38   : > { %2554 = vmatprep.mubr.msk.f32.mxu0 %vm302_vm1, %v286_v29 }
  0x3b   : > { %2555 = vmatmul.mubr.msk.f32.gmra.mrb[20].mxu0 %vm302_vm1, %v287_v30 }
  0x3c   : > { %2557 = vmatprep.mubr.msk.f32.mxu0 %vm302_vm1, %v288_v31 }
  0x3f   : > { %2558 = vmatmul.mubr.msk.f32.gmra.mrb[22].mxu0 %vm302_vm1, %v289_v32  ;;  %vm1818_vm1 = vcmask 1042434  }
  0xe6   : > { %v2526_v40 = vpop.f32.mrb[0].mxu0 }
  0xe7   : > { %v475_v41 = vadd.f32 %v2526_v40, %v2953_v39  ;;  %v469_v42 = vpop.f32.mrb[1].mxu0 }
  0xe8   : > { %v470_v43 = vadd.f32 %v2953_v39, %v469_v42  ;;  %v2961_v52 = vpop.f32.mrb[0].mxu1 }
  0xe9   : > { %v629_v46 = vmax.f32 %v475_v41, 0.0  ;;  %v2964_v56 = vpop.f32.mrb[1].mxu1 }
  0xea   : > { %v628_v44 = vmax.f32 %v470_v43, 0.0  ;;  %v2529_v45 = vpop.f32.mrb[2].mxu0 }
  0xeb   : > { %v485_v47 = vadd.f32 %v2529_v45, %v2953_v39  ;;  %v479_v48 = vpop.f32.mrb[3].mxu0 }
  0xec   : > { %v480_v49 = vadd.f32 %v2953_v39, %v479_v48  ;;  %2576 = vmatprep.mubr.msk.f32.mxu1 %vm3347_vm2, %v628_v44  ;;  %v2969_v60 = vpop.f32.mrb[2].mxu1 }
  0xed   : > { %2577 = vmatmul.mubr.msk.f32.vlgmr.msra.gmra.mrb[8].mxu1 %vm3347_vm2, %v629_v46  ;;  %v631_v53 = vmax.f32 %v485_v47, 0.0  ;;  %v2972_v0 = vpop.f32.mrb[3].mxu1 }
  0xee   : > { %v630_v50 = vmax.f32 %v480_v49, 0.0  ;;  %v2532_v51 = vpop.f32.mrb[4].mxu0 }
  0xef   : > { %v495_v54 = vadd.f32 %v2532_v51, %v2953_v39  ;;  %v489_v55 = vpop.f32.mrb[5].mxu0  ;;  %v590_v51 = vadd.f32 %v2953_v39, %v2964_v56 }
  0xf0   : > { %v490_v57 = vadd.f32 %v2953_v39, %v489_v55  ;;  %2579 = vmatprep.mubr.msk.f32.mxu1 %vm3347_vm2, %v630_v50  ;;  %v2977_v4 = vpop.f32.mrb[4].mxu1 }
  0xf1   : > { %2580 = vmatmul.mubr.msk.f32.gmra.mrb[10].mxu1 %vm3347_vm2, %v631_v53  ;;  %v633_v61 = vmax.f32 %v495_v54, 0.0  ;;  %v2980_v8 = vpop.f32.mrb[5].mxu1 }
  0xf2   : > { %v632_v58 = vmax.f32 %v490_v57, 0.0  ;;  %v2535_v59 = vpop.f32.mrb[6].mxu0 }
  0xf3   : > { %v505_v62 = vadd.f32 %v2535_v59, %v2953_v39  ;;  %v499_v63 = vpop.f32.mrb[7].mxu0  ;;  %v652_v59 = vmax.f32 %v590_v51, 0.0 }
  0xf4   : > { %v500_v1 = vadd.f32 %v2953_v39, %v499_v63  ;;  %2582 = vmatprep.mubr.msk.f32.mxu1 %vm3347_vm2, %v632_v58  ;;  %v2985_v12 = vpop.f32.mrb[6].mxu1  ;;  %v595_v63 = vadd.f32 %v2961_v52, %v2953_v39 }
  0xf5   : > { %2583 = vmatmul.mubr.msk.f32.gmra.mrb[12].mxu1 %vm3347_vm2, %v633_v61  ;;  %v635_v5 = vmax.f32 %v505_v62, 0.0  ;;  %v2988_v16 = vpop.f32.mrb[7].mxu1  ;;  %v600_v61 = vadd.f32 %v2953_v39, %v2972_v0 }
  0xf6   : > { %v634_v2 = vmax.f32 %v500_v1, 0.0  ;;  %v2538_v3 = vpop.f32.mrb[8].mxu0  ;;  %v610_v1 = vadd.f32 %v2953_v39, %v2980_v8  ;;  %v620_v52 = vadd.f32 %v2953_v39, %v2988_v16 }
  0xf7   : > { %v515_v6 = vadd.f32 %v2538_v3, %v2953_v39  ;;  %v509_v7 = vpop.f32.mrb[9].mxu0  ;;  %v654_v56 = vmax.f32 %v600_v61, 0.0  ;;  %v605_v3 = vadd.f32 %v2969_v60, %v2953_v39  ;;  %v625_v60 = vadd.f32 %v2985_v12, %v2953_v39 }
  0xf8   : > { %v510_v9 = vadd.f32 %v2953_v39, %v509_v7  ;;  %2585 = vmatprep.mubr.msk.f32.mxu1 %vm3347_vm2, %v634_v2  ;;  %v653_v2 = vmax.f32 %v595_v63, 0.0  ;;  %v656_v0 = vmax.f32 %v610_v1, 0.0  ;;  %v658_v7 = vmax.f32 %v620_v52, 0.0 }
  0xf9   : > { %2586 = vmatmul.mubr.msk.f32.gmra.mrb[14].mxu1 %vm3347_vm2, %v635_v5  ;;  %v637_v13 = vmax.f32 %v515_v6, 0.0  ;;  %v655_v5 = vmax.f32 %v605_v3, 0.0  ;;  %v615_v6 = vadd.f32 %v2977_v4, %v2953_v39  ;;  %v3046_v4 = vld [vmem:[%s3345_s2 + $0x78] ss:$0 sm:$0xff] }
  0xfa   : > { %v636_v10 = vmax.f32 %v510_v9, 0.0  ;;  %v2541_v11 = vpop.f32.mrb[10].mxu0  ;;  %v659_v9 = vmax.f32 %v625_v60, 0.0 }
  0xfb   : > { %v525_v14 = vadd.f32 %v2541_v11, %v2953_v39  ;;  %v519_v15 = vpop.f32.mrb[11].mxu0  ;;  %v657_v8 = vmax.f32 %v615_v6, 0.0 }
  0xfc   : > { %v520_v17 = vadd.f32 %v2953_v39, %v519_v15  ;;  %2588 = vmatprep.mubr.msk.f32.mxu1 %vm3347_vm2, %v636_v10 }
  0xfd   : > { %2589 = vmatmul.mubr.msk.f32.gmra.mrb[16].mxu1 %vm3347_vm2, %v637_v13  ;;  %v639_v20 = vmax.f32 %v525_v14, 0.0 }
  0xfe   : > { %v638_v18 = vmax.f32 %v520_v17, 0.0  ;;  %v2544_v19 = vpop.f32.mrb[12].mxu0 }
  0xff   : > { %v535_v21 = vadd.f32 %v2544_v19, %v2953_v39  ;;  %v529_v22 = vpop.f32.mrb[13].mxu0 }
 0x100   : > { %v530_v23 = vadd.f32 %v2953_v39, %v529_v22  ;;  %2591 = vmatprep.mubr.msk.f32.mxu1 %vm3347_vm2, %v638_v18 }
 0x101   : > { %2592 = vmatmul.mubr.msk.f32.gmra.mrb[18].mxu1 %vm3347_vm2, %v639_v20  ;;  %v641_v26 = vmax.f32 %v535_v21, 0.0 }
 0x102   : > { %v640_v24 = vmax.f32 %v530_v23, 0.0  ;;  %v2547_v25 = vpop.f32.mrb[14].mxu0 }
 0x103   : > { %v545_v27 = vadd.f32 %v2547_v25, %v2953_v39  ;;  %v539_v28 = vpop.f32.mrb[15].mxu0 }
 0x104   : > { %v540_v29 = vadd.f32 %v2953_v39, %v539_v28  ;;  %2594 = vmatprep.mubr.msk.f32.mxu1 %vm3347_vm2, %v640_v24 }
 0x105   : > { %2595 = vmatmul.mubr.msk.f32.gmra.mrb[20].mxu1 %vm3347_vm2, %v641_v26  ;;  %v643_v32 = vmax.f32 %v545_v27, 0.0 }
 0x106   : > { %v642_v30 = vmax.f32 %v540_v29, 0.0  ;;  %v2550_v31 = vpop.f32.mrb[16].mxu0 }
 0x107   : > { %v555_v33 = vadd.f32 %v2550_v31, %v2953_v39  ;;  %v549_v34 = vpop.f32.mrb[17].mxu0 }
 0x108   : > { %v550_v35 = vadd.f32 %v2953_v39, %v549_v34  ;;  %2597 = vmatprep.mubr.msk.f32.mxu1 %vm3347_vm2, %v642_v30 }
 0x109   : > { %2598 = vmatmul.mubr.msk.f32.gmra.mrb[22].mxu1 %vm3347_vm2, %v643_v32  ;;  %v645_v38 = vmax.f32 %v555_v33, 0.0 }
 0x10a   : > { %v644_v36 = vmax.f32 %v550_v35, 0.0  ;;  %v2553_v37 = vpop.f32.mrb[18].mxu0 }
 0x10b   : > { %v565_v40 = vadd.f32 %v2553_v37, %v2953_v39  ;;  %v559_v41 = vpop.f32.mrb[19].mxu0 }
 0x10c   : > { %v560_v42 = vadd.f32 %v2953_v39, %v559_v41  ;;  %2600 = vmatprep.mubr.msk.f32.mxu1 %vm3347_vm2, %v644_v36 }
 0x10d   : > { %2601 = vmatmul.mubr.msk.f32.gmra.mrb[24].mxu1 %vm3347_vm2, %v645_v38  ;;  %v647_v45 = vmax.f32 %v565_v40, 0.0 }
 0x10e   : > { %v646_v43 = vmax.f32 %v560_v42, 0.0  ;;  %v2556_v44 = vpop.f32.mrb[20].mxu0 }
 0x10f   : > { %v575_v46 = vadd.f32 %v2556_v44, %v2953_v39  ;;  %v569_v47 = vpop.f32.mrb[21].mxu0 }
 0x110   : > { %v570_v48 = vadd.f32 %v2953_v39, %v569_v47  ;;  %2603 = vmatprep.mubr.msk.f32.mxu1 %vm3347_vm2, %v646_v43 }
 0x111   : > { %2604 = vmatmul.mubr.msk.f32.gmra.mrb[26].mxu1 %vm3347_vm2, %v647_v45  ;;  %v649_v53 = vmax.f32 %v575_v46, 0.0 }
 0x112   : > { %v648_v49 = vmax.f32 %v570_v48, 0.0  ;;  %v2559_v50 = vpop.f32.mrb[22].mxu0 }
 0x113   : > { %v585_v54 = vadd.f32 %v2559_v50, %v2953_v39  ;;  %v579_v55 = vpop.f32.mrb[23].mxu0 }
 0x114   : > { %v580_v57 = vadd.f32 %v2953_v39, %v579_v55  ;;  %2606 = vmatprep.mubr.msk.f32.mxu1 %vm3347_vm2, %v648_v49 }
 0x115   : > { %2607 = vmatmul.mubr.msk.f32.gmra.mrb[28].mxu1 %vm3347_vm2, %v649_v53  ;;  %v651_v62 = vmax.f32 %v585_v54, 0.0 }
 0x116   : > { %v650_v58 = vmax.f32 %v580_v57, 0.0 }
 0x118   : > { %2609 = vmatprep.mubr.msk.f32.mxu1 %vm3347_vm2, %v650_v58 }
 0x119   : > { %2610 = vmatmul.mubr.msk.f32.gmra.mrb[30].mxu1 %vm3347_vm2, %v651_v62 }
 0x11a   : > { %2612 = vmatprep.mubr.msk.f32.mxu1 %vm3347_vm2, %v652_v59 }
 0x11d   : > { %2613 = vmatmul.mubr.msk.f32.gmra.mrb[32].mxu1 %vm3347_vm2, %v653_v2 }
 0x11e   : > { %2615 = vmatprep.mubr.msk.f32.mxu1 %vm3347_vm2, %v654_v56 }
 0x121   : > { %2616 = vmatmul.mubr.msk.f32.gmra.mrb[34].mxu1 %vm3347_vm2, %v655_v5 }
 0x122   : > { %2618 = vmatprep.mubr.msk.f32.mxu1 %vm3347_vm2, %v656_v0 }
 0x125   : > { %2619 = vmatmul.mubr.msk.f32.gmra.mrb[36].mxu1 %vm3347_vm2, %v657_v8 }
 0x126   : > { %2621 = vmatprep.mubr.msk.f32.mxu1 %vm3347_vm2, %v658_v7 }
 0x129   : > { %2622 = vmatmul.mubr.msk.f32.gmra.mrb[38].mxu1 %vm3347_vm2, %v659_v9 }
 0x1c0   : > { %v2578_v10 = vpop.f32.mrb[8].mxu1 }
 0x1c1   : > { %v833_v11 = vadd.f32 %v2578_v10, %v3046_v4  ;;  %v827_v13 = vpop.f32.mrb[9].mxu1 }
 0x1c2   : > { %v828_v14 = vadd.f32 %v3046_v4, %v827_v13 }
 0x1c3   : > { %v987_v12 = vmax.f32 %v833_v11, 0.0 }
 0x1c4   : > { %v986_v15 = vmax.f32 %v828_v14, 0.0  ;;  %v2581_v39 = vpop.f32.mrb[10].mxu1 }
 0x1c5   : > { %v843_v16 = vadd.f32 %v2581_v39, %v3046_v4  ;;  %v837_v17 = vpop.f32.mrb[11].mxu1 }
 0x1c6   : > { %v838_v18 = vadd.f32 %v3046_v4, %v837_v17  ;;  %2628 = vmatprep.mubr.msk.f32.mxu0 %vm3347_vm2, %v986_v15 }
 0x1c7   : > { %2629 = vmatmul.mubr.msk.f32.vlgmr.msra.gmra.mrb[24].mxu0 %vm3347_vm2, %v987_v12  ;;  %v989_v21 = vmax.f32 %v843_v16, 0.0 }
 0x1c8   : > { %v988_v19 = vmax.f32 %v838_v18, 0.0  ;;  %v2584_v20 = vpop.f32.mrb[12].mxu1 }
 0x1c9   : > { %v853_v22 = vadd.f32 %v2584_v20, %v3046_v4  ;;  %v847_v23 = vpop.f32.mrb[13].mxu1 }
 0x1ca   : > { %v848_v24 = vadd.f32 %v3046_v4, %v847_v23  ;;  %2631 = vmatprep.mubr.msk.f32.mxu0 %vm3347_vm2, %v988_v19 }
 0x1cb   : > { %2632 = vmatmul.mubr.msk.f32.gmra.mrb[26].mxu0 %vm3347_vm2, %v989_v21  ;;  %v991_v27 = vmax.f32 %v853_v22, 0.0 }
 0x1cc   : > { %v990_v25 = vmax.f32 %v848_v24, 0.0  ;;  %v2587_v26 = vpop.f32.mrb[14].mxu1 }
 0x1cd   : > { %v863_v28 = vadd.f32 %v2587_v26, %v3046_v4  ;;  %v857_v29 = vpop.f32.mrb[15].mxu1 }
 0x1ce   : > { %v858_v30 = vadd.f32 %v3046_v4, %v857_v29  ;;  %2634 = vmatprep.mubr.msk.f32.mxu0 %vm3347_vm2, %v990_v25 }
 0x1cf   : > { %2635 = vmatmul.mubr.msk.f32.gmra.mrb[28].mxu0 %vm3347_vm2, %v991_v27  ;;  %v993_v33 = vmax.f32 %v863_v28, 0.0 }
 0x1d0   : > { %v992_v31 = vmax.f32 %v858_v30, 0.0  ;;  %v2590_v32 = vpop.f32.mrb[16].mxu1 }
 0x1d1   : > { %v873_v34 = vadd.f32 %v2590_v32, %v3046_v4  ;;  %v867_v35 = vpop.f32.mrb[17].mxu1 }
 0x1d2   : > { %v868_v36 = vadd.f32 %v3046_v4, %v867_v35  ;;  %2637 = vmatprep.mubr.msk.f32.mxu0 %vm3347_vm2, %v992_v31 }
 0x1d3   : > { %2638 = vmatmul.mubr.msk.f32.gmra.mrb[30].mxu0 %vm3347_vm2, %v993_v33  ;;  %v995_v40 = vmax.f32 %v873_v34, 0.0 }
 0x1d4   : > { %v994_v37 = vmax.f32 %v868_v36, 0.0  ;;  %v2593_v38 = vpop.f32.mrb[18].mxu1 }
 0x1d5   : > { %v883_v41 = vadd.f32 %v2593_v38, %v3046_v4  ;;  %v877_v42 = vpop.f32.mrb[19].mxu1 }
 0x1d6   : > { %v878_v43 = vadd.f32 %v3046_v4, %v877_v42  ;;  %2640 = vmatprep.mubr.msk.f32.mxu0 %vm3347_vm2, %v994_v37 }
 0x1d7   : > { %2641 = vmatmul.mubr.msk.f32.gmra.mrb[32].mxu0 %vm3347_vm2, %v995_v40  ;;  %v997_v46 = vmax.f32 %v883_v41, 0.0 }
 0x1d8   : > { %v996_v44 = vmax.f32 %v878_v43, 0.0  ;;  %v2596_v45 = vpop.f32.mrb[20].mxu1  ;;  %v1375_v43 = vlaneseq }
 0x1d9   : > { %v893_v47 = vadd.f32 %v2596_v45, %v3046_v4  ;;  %v887_v48 = vpop.f32.mrb[21].mxu1 }
 0x1da   : > { %v888_v49 = vadd.f32 %v3046_v4, %v887_v48  ;;  %2643 = vmatprep.mubr.msk.f32.mxu0 %vm3347_vm2, %v996_v44  ;;  %v1379_v44 = vshrl.u32 %v1375_v43, 7  ;;  %v1376_v45 = vand.u32 127, %v1375_v43 }
 0x1db   : > { %2644 = vmatmul.mubr.msk.f32.gmra.mrb[34].mxu0 %vm3347_vm2, %v997_v46  ;;  %v999_v53 = vmax.f32 %v893_v47, 0.0 }
 0x1dc   : > { %v998_v50 = vmax.f32 %v888_v49, 0.0  ;;  %v2599_v51 = vpop.f32.mrb[22].mxu1  ;;  %v1387_v46 = vadd.s32 1, %v1379_v44  ;;  %v1377_v47 = vadd.s32 128, %v1376_v45  ;;  %v1381_v48 = vmul.u32 16, %v1379_v44 }
 0x1dd   : > { %v903_v54 = vadd.f32 %v2599_v51, %v3046_v4  ;;  %v897_v55 = vpop.f32.mrb[23].mxu1 }
 0x1de   : > { %v898_v57 = vadd.f32 %v3046_v4, %v897_v55  ;;  %2646 = vmatprep.mubr.msk.f32.mxu0 %vm3347_vm2, %v998_v50  ;;  %v1389_v49 = vmul.u32 16, %v1387_v46  ;;  %v1380_v50 = vadd.s32 8, %v1379_v44  ;;  %vm1384_vm3 = vcmp.ge.s32.totalorder %v1377_v47, %v1381_v48 }
 0x1df   : > { %2647 = vmatmul.mubr.msk.f32.gmra.mrb[36].mxu0 %vm3347_vm2, %v999_v53  ;;  %v1001_v61 = vmax.f32 %v903_v54, 0.0  ;;  %vm3112_vm5 = vcmp.ge.s32.totalorder %v1376_v45, %v1381_v48  ;;  %v2824_v54 = vmov 1.0  }
 0x1e0   : > { %v1000_v58 = vmax.f32 %v898_v57, 0.0  ;;  %v2602_v59 = vpop.f32.mrb[24].mxu1  ;;  %vm1392_vm4 = vcmp.lt.s32.totalorder %v1377_v47, %v1389_v49  ;;  %vm3116_vm6 = vcmp.lt.s32.totalorder %v1376_v45, %v1389_v49  ;;  %v1382_v55 = vmul.u32 16, %v1380_v50 }
 0x1e1   : > { %v913_v62 = vadd.f32 %v2602_v59, %v3046_v4  ;;  %v907_v63 = vpop.f32.mrb[25].mxu1  ;;  %vm1396_vm7 = vmand %vm1384_vm3, %vm1392_vm4  ;;  %vm1820_vm3 = vcmask 1043459   ;;  %vm1822_vm4 = vcmask 1044484   ;;  %v252_v59 = vld [vmem:[%s3345_s2 + $0x30] sm:$0x3f] }
 0x1e2   : > { %v908_v56 = vadd.f32 %v3046_v4, %v907_v63  ;;  %2649 = vmatprep.mubr.msk.f32.mxu0 %vm3347_vm2, %v1000_v58  ;;  %2337 = vmatprep.mubr.msk.f32.mxu1 %vm1396_vm7, %v2824_v54  ;;  %vm1395_vm8 = vmand %vm3112_vm5, %vm3116_vm6  ;;  %vm3125_vm9 = vcmp.ge.s32.totalorder %v1377_v47, %v1382_v55  ;;  %vm3137_vm12 = vcmp.ge.s32.totalorder %v1376_v45, %v1382_v55  ;;  %v3152_v63 = vld [vmem:[%s3345_s2 + $0x80] ss:$0 sm:$0xff]  ;;  %vm1824_vm7 = vcmask 1045509  }
 0x1e3   : > { %2650 = vmatmul.mubr.msk.f32.gmra.mrb[38].mxu0 %vm3347_vm2, %v1001_v61  ;;  %v1003_v3 = vmax.f32 %v913_v62, 0.0  ;;  %vm1635_vm5 = vcmask 1045504   ;;  %v251_v61 = vld [vmem:[%s3345_s2 + $0x28] sm:$0x7]  ;;  %vm1721_vm6 = vcmask 1042432  }
 0x1e4   : > { %v1002_v1 = vmax.f32 %v908_v56, 0.0  ;;  %v2605_v2 = vpop.f32.mrb[26].mxu1 }
 0x1e5   : > { %v923_v0 = vadd.f32 %v2605_v2, %v3046_v4  ;;  %v917_v52 = vpop.f32.mrb[27].mxu1 }
 0x1e6   : > { %v918_v5 = vadd.f32 %v3046_v4, %v917_v52  ;;  %2652 = vmatprep.mubr.msk.f32.mxu0 %vm3347_vm2, %v1002_v1 }
 0x1e7   : > { %2653 = vmatmul.mubr.msk.f32.gmra.mrb[40].mxu0 %vm3347_vm2, %v1003_v3  ;;  %v1005_v8 = vmax.f32 %v923_v0, 0.0 }
 0x1e8   : > { %v1004_v6 = vmax.f32 %v918_v5, 0.0  ;;  %v2608_v7 = vpop.f32.mrb[28].mxu1 }
 0x1e9   : > { %v933_v60 = vadd.f32 %v2608_v7, %v3046_v4  ;;  %v927_v9 = vpop.f32.mrb[29].mxu1 }
 0x1ea   : > { %v928_v10 = vadd.f32 %v3046_v4, %v927_v9  ;;  %2655 = vmatprep.mubr.msk.f32.mxu0 %vm3347_vm2, %v1004_v6 }
 0x1eb   : > { %2656 = vmatmul.mubr.msk.f32.gmra.mrb[42].mxu0 %vm3347_vm2, %v1005_v8  ;;  %v1007_v14 = vmax.f32 %v933_v60, 0.0 }
 0x1ec   : > { %v1006_v11 = vmax.f32 %v928_v10, 0.0  ;;  %v2611_v13 = vpop.f32.mrb[30].mxu1 }
 0x1ed   : > { %v943_v15 = vadd.f32 %v2611_v13, %v3046_v4  ;;  %v937_v39 = vpop.f32.mrb[31].mxu1 }
 0x1ee   : > { %v938_v12 = vadd.f32 %v3046_v4, %v937_v39  ;;  %2658 = vmatprep.mubr.msk.f32.mxu0 %vm3347_vm2, %v1006_v11 }
 0x1ef   : > { %2659 = vmatmul.mubr.msk.f32.gmra.mrb[44].mxu0 %vm3347_vm2, %v1007_v14  ;;  %v1009_v18 = vmax.f32 %v943_v15, 0.0 }
 0x1f0   : > { %v1008_v16 = vmax.f32 %v938_v12, 0.0  ;;  %v2614_v17 = vpop.f32.mrb[32].mxu1 }
 0x1f1   : > { %v953_v19 = vadd.f32 %v2614_v17, %v3046_v4  ;;  %v947_v20 = vpop.f32.mrb[33].mxu1 }
 0x1f2   : > { %v948_v21 = vadd.f32 %v3046_v4, %v947_v20  ;;  %2661 = vmatprep.mubr.msk.f32.mxu0 %vm3347_vm2, %v1008_v16 }
 0x1f3   : > { %2662 = vmatmul.mubr.msk.f32.gmra.mrb[46].mxu0 %vm3347_vm2, %v1009_v18  ;;  %v1011_v24 = vmax.f32 %v953_v19, 0.0 }
 0x1f4   : > { %v1010_v22 = vmax.f32 %v948_v21, 0.0  ;;  %v2617_v23 = vpop.f32.mrb[34].mxu1 }
 0x1f5   : > { %v963_v25 = vadd.f32 %v2617_v23, %v3046_v4  ;;  %v957_v26 = vpop.f32.mrb[35].mxu1 }
 0x1f6   : > { %v958_v27 = vadd.f32 %v3046_v4, %v957_v26  ;;  %2664 = vmatprep.mubr.msk.f32.mxu0 %vm3347_vm2, %v1010_v22 }
 0x1f7   : > { %2665 = vmatmul.mubr.msk.f32.gmra.mrb[48].mxu0 %vm3347_vm2, %v1011_v24  ;;  %v1013_v30 = vmax.f32 %v963_v25, 0.0 }
 0x1f8   : > { %v1012_v28 = vmax.f32 %v958_v27, 0.0  ;;  %v2620_v29 = vpop.f32.mrb[36].mxu1 }
 0x1f9   : > { %v973_v31 = vadd.f32 %v2620_v29, %v3046_v4  ;;  %v967_v32 = vpop.f32.mrb[37].mxu1 }
 0x1fa   : > { %v968_v33 = vadd.f32 %v3046_v4, %v967_v32  ;;  %2667 = vmatprep.mubr.msk.f32.mxu0 %vm3347_vm2, %v1012_v28 }
 0x1fb   : > { %2668 = vmatmul.mubr.msk.f32.gmra.mrb[50].mxu0 %vm3347_vm2, %v1013_v30  ;;  %v1015_v36 = vmax.f32 %v973_v31, 0.0 }
 0x1fc   : > { %v1014_v34 = vmax.f32 %v968_v33, 0.0  ;;  %v2623_v35 = vpop.f32.mrb[38].mxu1 }
 0x1fd   : > { %v983_v37 = vadd.f32 %v2623_v35, %v3046_v4  ;;  %v977_v38 = vpop.f32.mrb[39].mxu1 }
 0x1fe   : > { %v978_v40 = vadd.f32 %v3046_v4, %v977_v38  ;;  %2670 = vmatprep.mubr.msk.f32.mxu0 %vm3347_vm2, %v1014_v34  ;;  %v1388_v4 = vadd.s32 1, %v1380_v50 }
 0x1ff   : > { %2671 = vmatmul.mubr.msk.f32.gmra.mrb[52].mxu0 %vm3347_vm2, %v1015_v36  ;;  %v1017_v42 = vmax.f32 %v983_v37, 0.0 }
 0x200   : > { %v1016_v41 = vmax.f32 %v978_v40, 0.0  ;;  %v1390_v57 = vmul.u32 16, %v1388_v4 }
 0x202   : > { %2673 = vmatprep.mubr.msk.f32.mxu0 %vm3347_vm2, %v1016_v41  ;;  %vm3129_vm10 = vcmp.lt.s32.totalorder %v1377_v47, %v1390_v57  ;;  %vm3141_vm13 = vcmp.lt.s32.totalorder %v1376_v45, %v1390_v57 }
 0x203   : > { %2674 = vmatmul.mubr.msk.f32.gmra.mrb[54].mxu0 %vm3347_vm2, %v1017_v42  ;;  %vm1398_vm11 = vmand %vm3125_vm9, %vm3129_vm10  ;;  %vm1826_vm2 = vcmask 1046534   ;;  %vm3361_vm9 = vcmask 130048  }
 0x204   : > { %vm3362_vm10 = vmmov %vm3361_vm9 }
 0x29a   : > { %v2630_v56 = vpop.f32.mrb[24].mxu0 }
 0x29b   : > { %v1190_v1 = vadd.f32 %v2630_v56, %v3152_v63  ;;  %v1184_v2 = vpop.f32.mrb[25].mxu0 }
 0x29c   : > { %v1185_v3 = vadd.f32 %v3152_v63, %v1184_v2 }
 0x29d   : > { %v1344_v0 = vmax.f32 %v1190_v1, 0.0 }
 0x29e   : > { %v1343_v52 = vmax.f32 %v1185_v3, 0.0  ;;  %v2633_v5 = vpop.f32.mrb[26].mxu0 }
 0x29f   : > { %v1484_v6 = vsel %vm1482_vm15, %v1344_v0, -inf  ;;  %v1200_v7 = vadd.f32 %v2633_v5, %v3152_v63  ;;  %v1194_v8 = vpop.f32.mrb[27].mxu0 }
 0x2a0   : > { %v3158_v60 = vpack.c.bf16 %v1344_v0, %v1343_v52  ;;  %v1483_v9 = vsel %vm1482_vm15, %v1343_v52, -inf  ;;  %v1195_v10 = vadd.f32 %v3152_v63, %v1194_v8 }
 0x2a1   : > { %v1485_v11 = vmax.f32 %v1483_v9, %v1484_v6  ;;  %v1346_v13 = vmax.f32 %v1200_v7, 0.0 }
 0x2a2   : > { %v1345_v14 = vmax.f32 %v1195_v10, 0.0  ;;  %v2636_v15 = vpop.f32.mrb[28].mxu0 }
 0x2a3   : > { %v1486_v39 = vrot.slane %v1485_v11, 4  ;;  %v1493_v12 = vsel %vm1482_vm15, %v1346_v13, -inf  ;;  %v1210_v16 = vadd.f32 %v2636_v15, %v3152_v63  ;;  %v1204_v17 = vpop.f32.mrb[29].mxu0 }
 0x2a4   : > { %v3164_v18 = vpack.c.bf16 %v1346_v13, %v1345_v14  ;;  %v1492_v19 = vsel %vm1482_vm15, %v1345_v14, -inf  ;;  %v1205_v20 = vadd.f32 %v3152_v63, %v1204_v17 }
 0x2a5   : > { %v1487_v21 = vmax.f32 %v1485_v11, %v1486_v39  ;;  %v1494_v22 = vmax.f32 %v1492_v19, %v1493_v12  ;;  %v1348_v23 = vmax.f32 %v1210_v16, 0.0 }
 0x2a6   : > { %v1347_v24 = vmax.f32 %v1205_v20, 0.0  ;;  %v2639_v25 = vpop.f32.mrb[30].mxu0 }
 0x2a7   : > { %v1488_v26 = vrot.slane %v1487_v21, 2  ;;  %v1495_v27 = vrot.slane %v1494_v22, 4  ;;  %v1502_v28 = vsel %vm1482_vm15, %v1348_v23, -inf  ;;  %v1220_v29 = vadd.f32 %v2639_v25, %v3152_v63  ;;  %v1214_v30 = vpop.f32.mrb[31].mxu0 }
 0x2a8   : > { %v3170_v31 = vpack.c.bf16 %v1348_v23, %v1347_v24  ;;  %v1501_v32 = vsel %vm1482_vm15, %v1347_v24, -inf  ;;  %v1215_v33 = vadd.f32 %v3152_v63, %v1214_v30 }
 0x2a9   : > { %v1489_v34 = vmax.f32 %v1487_v21, %v1488_v26  ;;  %v1496_v35 = vmax.f32 %v1494_v22, %v1495_v27  ;;  %v1503_v36 = vmax.f32 %v1501_v32, %v1502_v28  ;;  %v1350_v37 = vmax.f32 %v1220_v29, 0.0 }
 0x2aa   : > { %v1349_v38 = vmax.f32 %v1215_v33, 0.0  ;;  %v2642_v40 = vpop.f32.mrb[32].mxu0 }
 0x2ab   : > { %v1490_v41 = vrot.slane %v1489_v34, 1  ;;  %v1497_v42 = vrot.slane %v1496_v35, 2  ;;  %v1504_v43 = vrot.slane %v1503_v36, 4  ;;  %v1511_v44 = vsel %vm1482_vm15, %v1350_v37, -inf  ;;  %v1224_v45 = vpop.f32.mrb[33].mxu0 }
 0x2ac   : > { %v3175_v46 = vpack.c.bf16 %v1350_v37, %v1349_v38  ;;  %v1510_v47 = vsel %vm1482_vm15, %v1349_v38, -inf  ;;  %v1230_v48 = vadd.f32 %v2642_v40, %v3152_v63  ;;  %v1225_v49 = vadd.f32 %v3152_v63, %v1224_v45 }
 0x2ad   : > { %v1498_v50 = vmax.f32 %v1496_v35, %v1497_v42  ;;  %v1505_v4 = vmax.f32 %v1503_v36, %v1504_v43  ;;  %v1512_v55 = vmax.f32 %v1510_v47, %v1511_v44  ;;  %v1491_v57 = vmax.f32 %v1489_v34, %v1490_v41 }
 0x2ae   : > { %v1352_v56 = vmax.f32 %v1230_v48, 0.0  ;;  %v1351_v1 = vmax.f32 %v1225_v49, 0.0  ;;  %v2645_v2 = vpop.f32.mrb[34].mxu0 }
 0x2af   : > { %v1499_v3 = vrot.slane %v1498_v50, 1  ;;  %v1506_v0 = vrot.slane %v1505_v4, 2  ;;  %v1513_v52 = vrot.slane %v1512_v55, 4  ;;  %v1240_v5 = vadd.f32 %v2645_v2, %v3152_v63  ;;  %v1234_v6 = vpop.f32.mrb[35].mxu0 }
 0x2b0   : > { %v1520_v7 = vsel %vm1482_vm15, %v1352_v56, -inf  ;;  %v3182_v8 = vpack.c.bf16 %v1352_v56, %v1351_v1  ;;  %v1519_v9 = vsel %vm1482_vm15, %v1351_v1, -inf  ;;  %v1235_v10 = vadd.f32 %v3152_v63, %v1234_v6 }
 0x2b1   : > { %v1500_v11 = vmax.f32 %v1498_v50, %v1499_v3  ;;  %v1507_v13 = vmax.f32 %v1505_v4, %v1506_v0  ;;  %v1514_v14 = vmax.f32 %v1512_v55, %v1513_v52  ;;  %v1521_v15 = vmax.f32 %v1519_v9, %v1520_v7 }
 0x2b2   : > { %v1354_v39 = vmax.f32 %v1240_v5, 0.0  ;;  %v1353_v12 = vmax.f32 %v1235_v10, 0.0  ;;  %v2648_v16 = vpop.f32.mrb[36].mxu0 }
 0x2b3   : > { %v1817_v17 = vsel %vm1816_vm0, %v1500_v11, %v1491_v57  ;;  %v1508_v19 = vrot.slane %v1507_v13, 1  ;;  %v1515_v20 = vrot.slane %v1514_v14, 2  ;;  %v1522_v21 = vrot.slane %v1521_v15, 4  ;;  %v1244_v22 = vpop.f32.mrb[37].mxu0 }
 0x2b4   : > { %v1529_v23 = vsel %vm1482_vm15, %v1354_v39, -inf  ;;  %v3188_v24 = vpack.c.bf16 %v1354_v39, %v1353_v12  ;;  %v1528_v25 = vsel %vm1482_vm15, %v1353_v12, -inf  ;;  %v1250_v26 = vadd.f32 %v2648_v16, %v3152_v63 }
 0x2b5   : > { %v1509_v27 = vmax.f32 %v1507_v13, %v1508_v19  ;;  %v1516_v28 = vmax.f32 %v1514_v14, %v1515_v20  ;;  %v1523_v29 = vmax.f32 %v1521_v15, %v1522_v21  ;;  %v1530_v30 = vmax.f32 %v1528_v25, %v1529_v23 }
 0x2b6   : > { %v1356_v32 = vmax.f32 %v1250_v26, 0.0  ;;  %v1245_v33 = vadd.f32 %v3152_v63, %v1244_v22  ;;  %v2651_v34 = vpop.f32.mrb[38].mxu0 }
 0x2b7   : > { %v1819_v35 = vsel %vm1818_vm1, %v1509_v27, %v1817_v17  ;;  %v1517_v36 = vrot.slane %v1516_v28, 1  ;;  %v1524_v37 = vrot.slane %v1523_v29, 2  ;;  %v1531_v38 = vrot.slane %v1530_v30, 4  ;;  %v1254_v40 = vpop.f32.mrb[39].mxu0 }
 0x2b8   : > { %v1538_v41 = vsel %vm1482_vm15, %v1356_v32, -inf  ;;  %v1355_v42 = vmax.f32 %v1245_v33, 0.0  ;;  %v1260_v43 = vadd.f32 %v2651_v34, %v3152_v63  ;;  %v1255_v44 = vadd.f32 %v3152_v63, %v1254_v40 }
 0x2b9   : > { %v1518_v45 = vmax.f32 %v1516_v28, %v1517_v36  ;;  %v1525_v47 = vmax.f32 %v1523_v29, %v1524_v37  ;;  %v1532_v48 = vmax.f32 %v1530_v30, %v1531_v38 }
 0x2ba   : > { %v3197_v49 = vpack.c.bf16 %v1356_v32, %v1355_v42  ;;  %v1537_v50 = vsel %vm1482_vm15, %v1355_v42, -inf  ;;  %v1358_v4 = vmax.f32 %v1260_v43, 0.0  ;;  %v1357_v55 = vmax.f32 %v1255_v44, 0.0  ;;  %v2654_v57 = vpop.f32.mrb[40].mxu0 }
 0x2bb   : > { %v1526_v56 = vrot.slane %v1525_v47, 1  ;;  %v1533_v1 = vrot.slane %v1532_v48, 2  ;;  %v1539_v2 = vmax.f32 %v1537_v50, %v1538_v41  ;;  %v1270_v3 = vadd.f32 %v2654_v57, %v3152_v63  ;;  %v1264_v0 = vpop.f32.mrb[41].mxu0 }
 0x2bc   : > { %v1547_v52 = vsel %vm1482_vm15, %v1358_v4, -inf  ;;  %v3202_v5 = vpack.c.bf16 %v1358_v4, %v1357_v55  ;;  %v1546_v6 = vsel %vm1482_vm15, %v1357_v55, -inf  ;;  %v1265_v7 = vadd.f32 %v3152_v63, %v1264_v0 }
 0x2bd   : > { %v1534_v9 = vmax.f32 %v1532_v48, %v1533_v1  ;;  %v1540_v10 = vrot.slane %v1539_v2, 4  ;;  %v1548_v11 = vmax.f32 %v1546_v6, %v1547_v52  ;;  %v1527_v13 = vmax.f32 %v1525_v47, %v1526_v56 }
 0x2be   : > { %v1360_v14 = vmax.f32 %v1270_v3, 0.0  ;;  %v1359_v15 = vmax.f32 %v1265_v7, 0.0  ;;  %v2657_v39 = vpop.f32.mrb[42].mxu0  ;;  %v1821_v12 = vsel %vm1820_vm3, %v1518_v45, %v1819_v35 }
 0x2bf   : > { %v1535_v16 = vrot.slane %v1534_v9, 1  ;;  %v1541_v17 = vmax.f32 %v1539_v2, %v1540_v10  ;;  %v1549_v19 = vrot.slane %v1548_v11, 4  ;;  %v1280_v20 = vadd.f32 %v2657_v39, %v3152_v63  ;;  %v1274_v21 = vpop.f32.mrb[43].mxu0 }
 0x2c0   : > { %v1556_v22 = vsel %vm1482_vm15, %v1360_v14, -inf  ;;  %v2717_v23 = vpack.c.bf16 %v1360_v14, %v1359_v15  ;;  %v1555_v25 = vsel %vm1482_vm15, %v1359_v15, -inf  ;;  %v1275_v26 = vadd.f32 %v3152_v63, %v1274_v21 }
 0x2c1   : > { %v1542_v27 = vrot.slane %v1541_v17, 2  ;;  %v1550_v28 = vmax.f32 %v1548_v11, %v1549_v19  ;;  %v1557_v29 = vmax.f32 %v1555_v25, %v1556_v22  ;;  %v1536_v30 = vmax.f32 %v1534_v9, %v1535_v16 }
 0x2c2   : > { %v1362_v32 = vmax.f32 %v1280_v20, 0.0  ;;  %v1361_v33 = vmax.f32 %v1275_v26, 0.0  ;;  %v2660_v34 = vpop.f32.mrb[44].mxu0  ;;  %2718 = vmatprep.subr.bf16.mxu1 %v2717_v23  ;;  %v1823_v35 = vsel %vm1822_vm4, %v1527_v13, %v1821_v12 }
 0x2c3   : > { %v1543_v36 = vmax.f32 %v1541_v17, %v1542_v27  ;;  %v1551_v37 = vrot.slane %v1550_v28, 2  ;;  %v1558_v38 = vrot.slane %v1557_v29, 4  ;;  %v1290_v40 = vadd.f32 %v2660_v34, %v3152_v63  ;;  %v1284_v41 = vpop.f32.mrb[45].mxu0  ;;  %2720 = vmatpush3.bf16.msra.mxu1 %v3158_v60 }
 0x2c4   : > { %v1565_v42 = vsel %vm1482_vm15, %v1362_v32, -inf  ;;  %v2721_v43 = vpack.c.bf16 %v1362_v32, %v1361_v33  ;;  %v1564_v44 = vsel %vm1482_vm15, %v1361_v33, -inf  ;;  %v1285_v45 = vadd.f32 %v3152_v63, %v1284_v41 }
 0x2c5   : > { %v1544_v47 = vrot.slane %v1543_v36, 1  ;;  %v1559_v48 = vmax.f32 %v1557_v29, %v1558_v38  ;;  %v1566_v50 = vmax.f32 %v1564_v44, %v1565_v42  ;;  %v1552_v4 = vmax.f32 %v1550_v28, %v1551_v37 }
 0x2c6   : > { %v1364_v55 = vmax.f32 %v1290_v40, 0.0  ;;  %v1363_v57 = vmax.f32 %v1285_v45, 0.0  ;;  %v2663_v56 = vpop.f32.mrb[46].mxu0  ;;  %2722 = vmatprep.subr.bf16.mxu1 %v2721_v43  ;;  %v1825_v1 = vsel %vm1824_vm7, %v1536_v30, %v1823_v35 }
 0x2c7   : > { %v1545_v2 = vmax.f32 %v1543_v36, %v1544_v47  ;;  %v1560_v60 = vrot.slane %v1559_v48, 2  ;;  %v1567_v3 = vrot.slane %v1566_v50, 4  ;;  %v1300_v0 = vadd.f32 %v2663_v56, %v3152_v63  ;;  %v1294_v52 = vpop.f32.mrb[47].mxu0  ;;  %2724 = vmatpush3.bf16.msra.mxu1 %v3164_v18 }
 0x2c8   : > { %v1574_v6 = vsel %vm1482_vm15, %v1364_v55, -inf  ;;  %v2725_v7 = vpack.c.bf16 %v1364_v55, %v1363_v57  ;;  %v1573_v9 = vsel %vm1482_vm15, %v1363_v57, -inf  ;;  %v1295_v10 = vadd.f32 %v3152_v63, %v1294_v52 }
 0x2c9   : > { %v1561_v11 = vmax.f32 %v1559_v48, %v1560_v60  ;;  %v1568_v13 = vmax.f32 %v1566_v50, %v1567_v3  ;;  %v1575_v14 = vmax.f32 %v1573_v9, %v1574_v6  ;;  %v1366_v15 = vmax.f32 %v1300_v0, 0.0 }
 0x2ca   : > { %v1365_v39 = vmax.f32 %v1295_v10, 0.0  ;;  %v2666_v12 = vpop.f32.mrb[48].mxu0  ;;  %2726 = vmatprep.subr.bf16.mxu1 %v2725_v7  ;;  %v1553_v16 = vrot.slane %v1552_v4, 1  ;;  %v1827_v17 = vsel %vm1826_vm2, %v1545_v2, %v1825_v1 }
 0x2cb   : > { %v1562_v19 = vrot.slane %v1561_v11, 1  ;;  %v1569_v20 = vrot.slane %v1568_v13, 2  ;;  %v1576_v18 = vrot.slane %v1575_v14, 4  ;;  %v1583_v21 = vsel %vm1482_vm15, %v1366_v15, -inf  ;;  %v1304_v22 = vpop.f32.mrb[49].mxu0  ;;  %2728 = vmatpush3.bf16.msra.mxu1 %v3170_v31 }
 0x2cc   : > { %v2729_v23 = vpack.c.bf16 %v1366_v15, %v1365_v39  ;;  %v1582_v25 = vsel %vm1482_vm15, %v1365_v39, -inf  ;;  %v1310_v26 = vadd.f32 %v2666_v12, %v3152_v63  ;;  %v1305_v27 = vadd.f32 %v3152_v63, %v1304_v22 }
 0x2cd   : > { %v1570_v28 = vmax.f32 %v1568_v13, %v1569_v20  ;;  %v1577_v29 = vmax.f32 %v1575_v14, %v1576_v18  ;;  %v1584_v30 = vmax.f32 %v1582_v25, %v1583_v21  ;;  %v1563_v32 = vmax.f32 %v1561_v11, %v1562_v19 }
 0x2ce   : > { %v1368_v33 = vmax.f32 %v1310_v26, 0.0  ;;  %v1367_v34 = vmax.f32 %v1305_v27, 0.0  ;;  %v2669_v35 = vpop.f32.mrb[50].mxu0  ;;  %2730 = vmatprep.subr.bf16.mxu1 %v2729_v23  ;;  %v1554_v36 = vmax.f32 %v1552_v4, %v1553_v16 }
 0x2cf   : > { %v1571_v37 = vrot.slane %v1570_v28, 1  ;;  %v1578_v38 = vrot.slane %v1577_v29, 2  ;;  %v1585_v31 = vrot.slane %v1584_v30, 4  ;;  %v1320_v40 = vadd.f32 %v2669_v35, %v3152_v63  ;;  %v1314_v41 = vpop.f32.mrb[51].mxu0  ;;  %2732 = vmatpush3.bf16.msra.mxu1 %v3175_v46 }
 0x2d0   : > { %v1592_v42 = vsel %vm1482_vm15, %v1368_v33, -inf  ;;  %v2733_v43 = vpack.c.bf16 %v1368_v33, %v1367_v34  ;;  %v1591_v44 = vsel %vm1482_vm15, %v1367_v34, -inf  ;;  %v1315_v45 = vadd.f32 %v3152_v63, %v1314_v41 }
 0x2d1   : > { %v1572_v47 = vmax.f32 %v1570_v28, %v1571_v37  ;;  %v1579_v48 = vmax.f32 %v1577_v29, %v1578_v38  ;;  %v1586_v50 = vmax.f32 %v1584_v30, %v1585_v31  ;;  %v1593_v55 = vmax.f32 %v1591_v44, %v1592_v42 }
 0x2d2   : > { %v1370_v4 = vmax.f32 %v1320_v40, 0.0  ;;  %v1369_v57 = vmax.f32 %v1315_v45, 0.0  ;;  %v2672_v56 = vpop.f32.mrb[52].mxu0  ;;  %2734 = vmatprep.subr.bf16.mxu1 %v2733_v43  ;;  %v3235_v1 = vsel %vm1828_vm14, %v1554_v36, %v1827_v17 }
 0x2d3   : > { %v1830_v46 = vsel %vm1816_vm0, %v1572_v47, %v1563_v32  ;;  %v1580_v2 = vrot.slane %v1579_v48, 1  ;;  %v1587_v60 = vrot.slane %v1586_v50, 2  ;;  %v1594_v3 = vrot.slane %v1593_v55, 4  ;;  %v1324_v0 = vpop.f32.mrb[53].mxu0  ;;  %2736 = vmatpush3.bf16.msra.mxu1 %v3182_v8  ;;  %vm3360_vm0 = vmand %vm3137_vm12, %vm3141_vm13 }
 0x2d4   : > { %v1601_v52 = vsel %vm1482_vm15, %v1370_v4, -inf  ;;  %v2737_v6 = vpack.c.bf16 %v1370_v4, %v1369_v57  ;;  %v1600_v7 = vsel %vm1482_vm15, %v1369_v57, -inf  ;;  %v1330_v9 = vadd.f32 %v2672_v56, %v3152_v63 }
 0x2d5   : > { %v1581_v10 = vmax.f32 %v1579_v48, %v1580_v2  ;;  %v1588_v11 = vmax.f32 %v1586_v50, %v1587_v60  ;;  %v1595_v13 = vmax.f32 %v1593_v55, %v1594_v3  ;;  %v1602_v14 = vmax.f32 %v1600_v7, %v1601_v52  ;;  %v1627_v52 = vld [vmem:[%s234_s20] sm:$0xff] }
 0x2d6   : > { %v1372_v15 = vmax.f32 %v1330_v9, 0.0  ;;  %v1325_v39 = vadd.f32 %v3152_v63, %v1324_v0  ;;  %v2675_v12 = vpop.f32.mrb[54].mxu0  ;;  %2738 = vmatprep.subr.bf16.mxu1 %v2737_v6  ;;  %v253_v6 = vld [vmem:[%s3345_s2 + $0x38] sm:$0x3f]  ;;  %v254_v7 = vld [vmem:[%s3345_s2 + $0x40] sm:$0xff]  ;;  %v255_v9 = vld [vmem:[%s3345_s2 + $0x48] sm:$0xff] }
 0x2d7   : > { %v1831_v16 = vsel %vm1818_vm1, %v1581_v10, %v1830_v46  ;;  %v1589_v17 = vrot.slane %v1588_v11, 1  ;;  %v1596_v8 = vrot.slane %v1595_v13, 2  ;;  %v1603_v19 = vrot.slane %v1602_v14, 4  ;;  %v1334_v20 = vpop.f32.mrb[55].mxu0  ;;  %2740 = vmatpush3.bf16.msra.mxu1 %v3188_v24  ;;  %v1628_v10 = vld [vmem:[%s234_s20 + $0x8] sm:$0xff] }
 0x2d8   : > { %v1610_v18 = vsel %vm1482_vm15, %v1372_v15, -inf  ;;  %v1371_v21 = vmax.f32 %v1325_v39, 0.0  ;;  %v1340_v22 = vadd.f32 %v2675_v12, %v3152_v63  ;;  %v1335_v23 = vadd.f32 %v3152_v63, %v1334_v20  ;;  %v258_v20 = vld [vmem:[%s3345_s2 + $0x60] sm:$0xff] }
 0x2d9   : > { %v1590_v25 = vmax.f32 %v1588_v11, %v1589_v17  ;;  %v1597_v26 = vmax.f32 %v1595_v13, %v1596_v8  ;;  %v1604_v27 = vmax.f32 %v1602_v14, %v1603_v19  ;;  %v2749_v11 = vpack.c.bf16 %v255_v9, %v254_v7  ;;  %v256_v13 = vld [vmem:[%s3345_s2 + $0x50] sm:$0xff]  ;;  %v257_v14 = vld [vmem:[%s3345_s2 + $0x58] sm:$0xff] }
 0x2da   : > { %v2741_v28 = vpack.c.bf16 %v1372_v15, %v1371_v21  ;;  %v1609_v29 = vsel %vm1482_vm15, %v1371_v21, -inf  ;;  %v1374_v30 = vmax.f32 %v1340_v22, 0.0  ;;  %v1373_v32 = vmax.f32 %v1335_v23, 0.0  ;;  %v2351_v22 = vld [vmem:[%s3345_s2 + $0x90] ss:$0 sm:$0xff] }
 0x2db   : > { %v1832_v33 = vsel %vm1820_vm3, %v1590_v25, %v1831_v16  ;;  %v1598_v34 = vrot.slane %v1597_v26, 1  ;;  %v1605_v35 = vrot.slane %v1604_v27, 2  ;;  %v1611_v24 = vmax.f32 %v1609_v29, %v1610_v18  ;;  %v259_v18 = vld [vmem:[%s3345_s2 + $0x68] sm:$0xff] }
 0x2dc   : > { %v1619_v36 = vsel %vm1482_vm15, %v1374_v30, -inf  ;;  %v2745_v37 = vpack.c.bf16 %v1374_v30, %v1373_v32  ;;  %v1618_v38 = vsel %vm1482_vm15, %v1373_v32, -inf  ;;  %2742 = vmatprep.subr.bf16.mxu1 %v2741_v28  ;;  %v2753_v15 = vpack.c.bf16 %v257_v14, %v256_v13  ;;  %v2354_v30 = vld [vmem:[%s3345_s2 + $0x98] ss:$0 sm:$0xff] }
 0x2dd   : > { %v1599_v63 = vmax.f32 %v1597_v26, %v1598_v34  ;;  %v1606_v31 = vmax.f32 %v1604_v27, %v1605_v35  ;;  %v1612_v40 = vrot.slane %v1611_v24, 4  ;;  %v1620_v41 = vmax.f32 %v1618_v38, %v1619_v36  ;;  %2744 = vmatpush3.bf16.msra.mxu1 %v3197_v49 }
 0x2de   : > { %2746 = vmatprep.subr.bf16.mxu1 %v2745_v37  ;;  %v2757_v21 = vpack.c.bf16 %v259_v18, %v258_v20 }
 0x2df   : > { %v1607_v42 = vrot.slane %v1606_v31, 1  ;;  %v1613_v43 = vmax.f32 %v1611_v24, %v1612_v40  ;;  %v1621_v44 = vrot.slane %v1620_v41, 4  ;;  %v1833_v45 = vsel %vm1822_vm4, %v1599_v63, %v1832_v33 }
 0x2e1   : > { %v1608_v47 = vmax.f32 %v1606_v31, %v1607_v42  ;;  %v1614_v48 = vrot.slane %v1613_v43, 2  ;;  %v1622_v50 = vmax.f32 %v1620_v41, %v1621_v44  ;;  %2748 = vmatpush3.bf16.msra.mxu1 %v3202_v5 }
 0x2e2   : > { %2676 = vmatprep.subr.msk.mxu1 %vm1635_vm5, %v252_v59 }
 0x2e3   : > { %v1615_v55 = vmax.f32 %v1613_v43, %v1614_v48  ;;  %v1623_v4 = vrot.slane %v1622_v50, 2  ;;  %v1834_v57 = vsel %vm1824_vm7, %v1608_v47, %v1833_v45 }
 0x2e4   : > { %2338 = vmatmul.mubr.msk.f32.vlgmr.msra.gmra.mrb[40].mxu1 %vm1395_vm8, %v2824_v54  ;;  %vm1933_vm8 = vcmask 261120  }
 0x2e5   : > { %v1616_v49 = vrot.slane %v1615_v55, 1  ;;  %v1624_v56 = vmax.f32 %v1622_v50, %v1623_v4  ;;  %2339 = vmatprep.mubr.msk.f32.mxu1 %vm1398_vm11, %v2824_v54  ;;  %2677 = vmatpush3.msk.msra.mxu1 %vm1635_vm5, %v252_v59  ;;  %vm2114_vm11 = vcmask 7168  }
 0x2e6   : > { %2681 = vmatprep.subr.msk.mxu1 %vm1721_vm6, %v251_v61 }
 0x2e7   : > { %v1617_v5 = vmax.f32 %v1615_v55, %v1616_v49  ;;  %v1625_v46 = vrot.slane %v1624_v56, 1 }
 0x2e8   : > { %2340 = vmatmul.mubr.msk.f32.gmra.mrb[42].mxu1 %vm3360_vm0, %v2824_v54 }
 0x2e9   : > { %v1626_v51 = vmax.f32 %v1624_v56, %v1625_v46  ;;  %v1835_v53 = vsel %vm1826_vm2, %v1617_v5, %v1834_v57  ;;  %vm1714_vm2 = vcmask 23552  }
 0x2eb   : > { %v1836_v58 = vsel %vm1828_vm14, %v1626_v51, %v1835_v53 }
 0x3b7   : > { %v2497_v54 = vpop.f32.mrb[40].mxu1 }
 0x3b8   : > { %v2498_v62 = vpop.f32.mrb[41].mxu1 }
 0x3b9   : > { %v2499_v2 = vadd.f32 %v2498_v62, %v2497_v54 }
 0x3bb   : > { %v2500_v60 = vpop.f32.mrb[42].mxu1  ;;  %2678 = vmatprep.mubr.msk.f32.mxu1 %vm1482_vm15, %v2499_v2 }
 0x3bc   : > { %v2501_v3 = vpop.f32.mrb[43].mxu1 }
 0x3bd   : > { %v2502_v0 = vadd.f32 %v2501_v3, %v2500_v60 }
 0x3bf   : > { %2679 = vmatmul.mubr.msk.f32.vlgmr.msra.gmra.mrb[44].mxu1 %vm1482_vm15, %v2502_v0 }
 0x3c0   : > { %2682 = vmatpush3.msk.msra.mxu1 %vm1721_vm6, %v251_v61  ;;  %2683 = vmatprep.mubr.msk.f32.mxu1 %vm1714_vm2, %v1627_v52 }
 0x3c1   : > { %2686 = vmatprep.subr.msk.mxu1 %vm1635_vm5, %v253_v6 }
 0x3c7   : > { %2684 = vmatmul.mubr.msk.f32.vlgmr.msra.gmra.mrb[44].mxu1 %vm1714_vm2, %v1628_v10 }
 0x3c8   : > { %2688 = vmatprep.mubr.msk.f32.mxu1 %vm1482_vm15, %v3235_v1  ;;  %2687 = vmatpush3.msk.msra.mxu1 %vm1635_vm5, %v253_v6  ;;  %v2350_v1 = vld [vmem:[%s3345_s2 + $0x88] ss:$0 sm:$0xff] }
 0x3c9   : > { %2750 = vmatprep.subr.bf16.mxu1 %v2749_v11 }
 0x3cf   : > { %2689 = vmatmul.mubr.msk.f32.vlgmr.msra.gmra.mrb[44].mxu1 %vm1482_vm15, %v1836_v58 }
 0x3d0   : > { %2752 = vmatpush3.bf16.msra.mxu1 %v2749_v11 }
 0x3d1   : > { %2754 = vmatprep.subr.bf16.mxu1 %v2753_v15 }
 0x3d4   : > { %2756 = vmatpush3.bf16.msra.mxu1 %v2753_v15 }
 0x3d5   : > { %2758 = vmatprep.subr.bf16.mxu1 %v2757_v21 }
 0x4a2   : > { %v2690_v39 = vpop.f32.mrb[44].mxu1 }
 0x4a3   : > { %v1926_v12 = vadd.f32 %v2690_v39, %v2350_v1  ;;  %v1910_v16 = vpop.f32.mrb[45].mxu1 }
 0x4a4   : > { %v1925_v17 = vadd.f32 %v2350_v1, %v1910_v16 }
 0x4a5   : > { %v1928_v19 = vmax.f32 %v1926_v12, 0.0 }
 0x4a6   : > { %v1927_v8 = vmax.f32 %v1925_v17, 0.0 }
 0x4a8   : > { %2699 = vmatprep.mubr.msk.f32.mxu1 %vm1933_vm8, %v1927_v8 }
 0x4a9   : > { %2700 = vmatmul.mubr.msk.f32.vlgmr.msra.gmra.mrb[46].mxu1 %vm1933_vm8, %v1928_v19 }
 0x4aa   : > { %2760 = vmatpush3.bf16.msra.mxu1 %v2757_v21 }
 0x57c   : > { %v2701_v23 = vpop.f32.mrb[46].mxu1 }
 0x57d   : > { %v2012_v25 = vadd.f32 %v2701_v23, %v2351_v22  ;;  %v2006_v26 = vpop.f32.mrb[47].mxu1 }
 0x57e   : > { %v2007_v27 = vadd.f32 %v2351_v22, %v2006_v26 }
 0x57f   : > { %v2016_v29 = vmax.f32 %v2012_v25, 0.0 }
 0x580   : > { %v2015_v28 = vmax.f32 %v2007_v27, 0.0 }
 0x582   : > { %2706 = vmatprep.mubr.msk.f32.mxu1 %vm3361_vm9, %v2015_v28 }
 0x583   : > { %2707 = vmatmul.mubr.msk.f32.vlgmr.msra.gmra.mrb[48].mxu1 %vm3362_vm10, %v2016_v29 }
 0x656   : > { %v2708_v32 = vpop.f32.mrb[48].mxu1 }
 0x657   : > { %v2099_v33 = vadd.f32 %v2708_v32, %v2354_v30  ;;  %v2093_v34 = vpop.f32.mrb[49].mxu1 }
 0x658   : > { %v2094_v35 = vadd.f32 %v2354_v30, %v2093_v34 }
 0x659   : > { %v2358_v24 = vmul.f32 -1.442695, %v2099_v33 }
 0x65a   : > { %v2357_v36 = vmul.f32 -1.442695, %v2094_v35 }
 0x65b   : > { %2792 = vpow2.f32 %v2358_v24 }
 0x65c   : > { %2794 = vpow2.f32 %v2357_v36 }
 0x665   : > { %v2793_v37 = vpop.eup %2792 }
 0x666   : > { %v2795_v38 = vpop.eup %2794  ;;  %v2109_v63 = vadd.f32 1.0, %v2793_v37 }
 0x667   : > { %v2108_v31 = vadd.f32 1.0, %v2795_v38 }
 0x668   : > { %2796 = vrcp.f32 %v2109_v63 }
 0x669   : > { %2798 = vrcp.f32 %v2108_v31 }
 0x672   : > { %v2797_v40 = vpop.eup %2796 }
 0x673   : > { %v2799_v41 = vpop.eup %2798  ;;  %2116 = vst.msk [vmem:[%s244_s21 + $0x8] sm:$0xff] %vm2114_vm11, %v2797_v40 }
 0x674   : > { %2115 = vst.msk [vmem:[%s244_s21] sm:$0xff] %vm2114_vm11, %v2799_v41 }
 0x675 PF: > { %s13_s14 = sadd.s32 1, %s2822_s14   ;;  %s3363_s12 = smov %s2818_s13 }
 0x676   : > { %p10_p5 = scmp.ge.s32.totalorder %s13_s14, 4   ;;  %s3364_s13 = smov %s3366_s15 }
 0x678   :  { %12 = sbr.rel (!%p10_p5) target bundleno = 2 (0x2), region = 65 }

</bundles_post_ra>
